<compile_context>
chip_gen: v7x
topology: tpu7x:2x2x1
jax: 0.10.0
libtpu: 0.0.40
codegen_flags: <defaults>
</compile_context>

<pallas_src>
import functools

import jax
import jax.numpy as jnp
from jax import lax
from jax.experimental import pallas as pl
from jax.experimental.pallas import tpu as pltpu


# ----------------------------- fused MHA kernel -----------------------------
def _mha_kernel(x_ref, wq_ref, wkv_ref, wo_ref, bo_ref, o_ref,
                kt_scr, v_scr, att_scr, *,
                n_heads, head_size, q_tile, compute_dtype):
    """Grid point = (batch element b, query tile qt).

    x_ref   : (1, T, C)    full sequence for this batch element (stays resident across qt)
    wq_ref  : (C, C)       Q weights, head-major columns, 1/sqrt(H) pre-folded
    wkv_ref : (C, 2C)      [K heads | V heads] weights
    wo_ref  : (C, C)       output projection (in, out)
    bo_ref  : (1, C)       output bias (f32)
    o_ref   : (1, TQ, C)   lane-dense output slab for this query tile
    kt_scr  : (C, T)       K^T scratch, computed once per batch element
    v_scr   : (T, C)       V scratch, computed once per batch element
    att_scr : (TQ, C) f32  per-head attention outputs (concat-free)
    """
    qt = pl.program_id(1)
    _, T, C = x_ref.shape
    H = head_size
    TQ = q_tile
    cdt = compute_dtype

    # ---- K / V projections once per batch element, persisted across q tiles.
    @pl.when(qt == 0)
    def _project_kv():
        x_all = x_ref[0].astype(cdt)                                        # (T, C)
        kv = jnp.dot(x_all, wkv_ref[...],
                     preferred_element_type=jnp.float32)                    # (T, 2C) f32
        kt_scr[...] = kv[:, :C].T.astype(kt_scr.dtype)   # one transpose for all heads
        v_scr[...] = kv[:, C:].astype(v_scr.dtype)

    # ---- Q projection for this tile (1/sqrt(H) already folded into wq).
    q_start = pl.multiple_of(qt * TQ, TQ)
    xq = x_ref[0, pl.ds(q_start, TQ), :].astype(cdt)                        # (TQ, C)
    q = jnp.dot(xq, wq_ref[...], preferred_element_type=jnp.float32).astype(cdt)

    # Causal mask for this tile's global query rows (applied to f32 scores only).
    row = lax.broadcasted_iota(jnp.int32, (TQ, T), 0) + qt * TQ
    col = lax.broadcasted_iota(jnp.int32, (TQ, T), 1)
    causal = col <= row
    neg_big = jnp.float32(-1e30)

    for h in range(n_heads):                       # static loop over heads
        qh = q[:, h * H:(h + 1) * H]               # (TQ, H)
        kth = kt_scr[h * H:(h + 1) * H, :]         # (H, T) sublane slice of K^T
        s = jnp.dot(qh, kth, preferred_element_type=jnp.float32)            # (TQ, T) f32
        s = jnp.where(causal, s, neg_big)

        # Numerically stable softmax in f32; reciprocal on the EUP slot.
        m = jnp.max(s, axis=-1, keepdims=True)
        e = jnp.exp(s - m)
        p = e * pl.reciprocal(jnp.sum(e, axis=-1, keepdims=True), approx=True)

        vh = v_scr[:, h * H:(h + 1) * H]           # (T, H)
        att_scr[:, h * H:(h + 1) * H] = jnp.dot(p.astype(cdt), vh,
                                                preferred_element_type=jnp.float32)

    # Fused output projection (+ bias); single lane-dense store.
    y = jnp.dot(att_scr[...].astype(cdt), wo_ref[...],
                preferred_element_type=jnp.float32) + bo_ref[...]
    o_ref[0] = y.astype(o_ref.dtype)


def _pick_q_tile(T, max_tile=256):
    """Largest query tile <= max_tile that divides T (falls back to T)."""
    if T <= max_tile:
        return T
    for cand in (max_tile, 128, 64, 32, 16, 8):
        if T % cand == 0:
            return cand
    return T


def multi_head_attention(x, params, compute_dtype=jnp.bfloat16, q_tile=256):
    """Forward of MultiHeadAttention (eval mode: dropout = identity).

    x: (B, T, C); params["wq"/"wk"/"wv"]: (n_heads, C, H) (already (in, out) per head);
    params["w_out"]: (C, C) as (in, out); params["b_out"]: (1, C).
    compute_dtype: jnp.bfloat16 (default) -> bf16 MXU operands with f32 accumulation
    and f32 softmax; None -> matmul operands stay in the input dtype.
    """
    wq, wk, wv = params["wq"], params["wk"], params["wv"]
    w_out, b_out = params["w_out"], params["b_out"]

    B, T, C = x.shape
    n_heads, _, H = wq.shape
    assert n_heads * H == C, (n_heads, H, C)

    cdt = compute_dtype if compute_dtype is not None else x.dtype
    tq = _pick_q_tile(T, q_tile)
    assert T % tq == 0, (T, tq)

    def fuse(w):  # (n_heads, C, H) -> (C, n_heads*H); head h lives in cols [h*H, (h+1)*H)
        return jnp.transpose(w, (1, 0, 2)).reshape(C, n_heads * H)

    # Fold 1/sqrt(H) into the Q columns and pre-cast all weights to the compute
    # dtype ONCE here (one-time wrapper cost; halves weight DMA/VMEM in bf16 mode).
    wq_f = (fuse(wq) * (jnp.float32(H) ** jnp.float32(-0.5))).astype(cdt)    # (C, C)
    wkv_f = jnp.concatenate([fuse(wk), fuse(wv)], axis=-1).astype(cdt)       # (C, 2C)
    wo_f = w_out.astype(cdt)                                                 # (C, C)
    bo_f = b_out.astype(jnp.float32)                                         # (1, C)

    kernel = functools.partial(_mha_kernel, n_heads=n_heads, head_size=H,
                               q_tile=tq, compute_dtype=cdt)

    return pl.pallas_call(
        kernel,
        out_shape=jax.ShapeDtypeStruct((B, T, C), x.dtype),
        grid_spec=pltpu.PrefetchScalarGridSpec(
            num_scalar_prefetch=0,
            grid=(B, T // tq),
            in_specs=[
                # Full sequence per batch element; block index is constant across
                # qt so it stays VMEM-resident for every query tile of this b.
                pl.BlockSpec((1, T, C), lambda b, qt: (b, 0, 0)),
                # Grid-invariant weights: single-buffered (no wasted double buffer).
                pl.BlockSpec((C, C), lambda b, qt: (0, 0),
                             pipeline_mode=pl.Buffered(1)),
                pl.BlockSpec((C, 2 * C), lambda b, qt: (0, 0),
                             pipeline_mode=pl.Buffered(1)),
                pl.BlockSpec((C, C), lambda b, qt: (0, 0),
                             pipeline_mode=pl.Buffered(1)),
                pl.BlockSpec((1, C), lambda b, qt: (0, 0),
                             pipeline_mode=pl.Buffered(1)),
            ],
            out_specs=pl.BlockSpec((1, tq, C), lambda b, qt: (b, qt, 0)),
            scratch_shapes=[
                pltpu.VMEM((C, T), cdt),             # K^T (per batch element)
                pltpu.VMEM((T, C), cdt),             # V   (per batch element)
                pltpu.VMEM((tq, C), jnp.float32),    # per-head attention outputs
            ],
        ),
        compiler_params=pltpu.CompilerParams(
            dimension_semantics=("parallel", "arbitrary"),
            # 56 MiB: fits under v7x's 64 MiB physical VMEM; could be raised to
            # ~100 MiB on v5e/v6e (128 MiB physical) if the working set grows.
            vmem_limit_bytes=56 * 1024 * 1024,
        ),
    )(x, wq_f, wkv_f, wo_f, bo_f)


# ------------------------------- reference (pure JAX) -------------------------------
def multi_head_attention_ref(x, params):
    wq, wk, wv = params["wq"], params["wk"], params["wv"]
    w_out, b_out = params["w_out"], params["b_out"]
    B, T, C = x.shape
    n_heads, _, H = wq.shape
    outs = []
    tril = jnp.tril(jnp.ones((T, T), dtype=bool))
    for h in range(n_heads):
        q = x @ wq[h]
        k = x @ wk[h]
        v = x @ wv[h]
        s = (q @ jnp.swapaxes(k, -2, -1)) * (H ** -0.5)
        s = jnp.where(tril, s, -jnp.inf)
        p = jax.nn.softmax(s, axis=-1)
        outs.append(p @ v)
    cat = jnp.concatenate(outs, axis=-1)
    return cat @ w_out + b_out[0]


if __name__ == "__main__":
    # Small shapes consistent with the module: n_heads * head_size == n_embed.
    B = 2
    T = 8             # block_size (sequence length)
    n_embed = 32
    n_heads = 4
    head_size = n_embed // n_heads   # 8

    key = jax.random.PRNGKey(0)
    kx, kq, kk, kv_, kw, kb = jax.random.split(key, 6)

    x = jax.random.normal(kx, (B, T, n_embed), dtype=jnp.float32)

    scale = 1.0 / jnp.sqrt(jnp.float32(n_embed))
    params = {
        "wq": jax.random.normal(kq, (n_heads, n_embed, head_size), jnp.float32) * scale,
        "wk": jax.random.normal(kk, (n_heads, n_embed, head_size), jnp.float32) * scale,
        "wv": jax.random.normal(kv_, (n_heads, n_embed, head_size), jnp.float32) * scale,
        "w_out": jax.random.normal(kw, (n_embed, n_embed), jnp.float32) * scale,
        "b_out": jax.random.normal(kb, (1, n_embed), jnp.float32) * 0.01,
    }

    fwd = jax.jit(multi_head_attention, static_argnames=("compute_dtype", "q_tile"))
    ref = multi_head_attention_ref(x, params)

    # Exact-ish f32 operand path (approx reciprocal adds ~1e-4 relative error).
    out_f32 = jax.block_until_ready(fwd(x, params, compute_dtype=None))
    assert out_f32.shape == (B, T, n_embed), out_f32.shape
    assert jnp.allclose(out_f32, ref, atol=5e-3, rtol=5e-3), "f32 path mismatch vs JAX reference"

    # Default bf16 MXU-operand path (f32 accumulation / f32 softmax).
    out_bf16 = jax.block_until_ready(fwd(x, params))
    assert out_bf16.shape == (B, T, n_embed), out_bf16.shape
    assert jnp.allclose(out_bf16, ref, atol=1e-1, rtol=1e-1), "bf16 path mismatch vs JAX reference"

    print("KERNEL_OK")
</pallas_src>

<mosaic_0001>
module attributes {stable_mosaic.version = 11 : i64} {
  func.func @_mha_kernel(%arg0: i32, %arg1: i32, %arg2: memref<1x8x32xf32, #tpu.memory_space<vmem>>, %arg3: memref<32x32xf32, #tpu.memory_space<vmem>>, %arg4: memref<32x64xf32, #tpu.memory_space<vmem>>, %arg5: memref<32x32xf32, #tpu.memory_space<vmem>>, %arg6: memref<1x32xf32, #tpu.memory_space<vmem>>, %arg7: memref<1x8x32xf32, #tpu.memory_space<vmem>>, %arg8: memref<32x8xf32, #tpu.memory_space<vmem>>, %arg9: memref<8x32xf32, #tpu.memory_space<vmem>>, %arg10: memref<8x32xf32, #tpu.memory_space<vmem>>) attributes {dimension_semantics = [#tpu.dimension_semantics<parallel>, #tpu.dimension_semantics<arbitrary>], iteration_bounds = array<i64: 2, 1>, scalar_prefetch = 0 : i64, scratch_operands = 3 : i64, tpu.core_type = #tpu.core_type<tc>, window_params = [{transform_indices = @transform_0, window_bounds = array<i64: 1, 8, 32>}, {pipeline_mode = #tpu.pipeline_mode<synchronous>, transform_indices = @transform_1, window_bounds = array<i64: 32, 32>}, {pipeline_mode = #tpu.pipeline_mode<synchronous>, transform_indices = @transform_2, window_bounds = array<i64: 32, 64>}, {pipeline_mode = #tpu.pipeline_mode<synchronous>, transform_indices = @transform_3, window_bounds = array<i64: 32, 32>}, {pipeline_mode = #tpu.pipeline_mode<synchronous>, transform_indices = @transform_4, window_bounds = array<i64: 1, 32>}, {transform_indices = @transform_5, window_bounds = array<i64: 1, 8, 32>}]} {
    %c0_i32 = arith.constant 0 : i32
    %0 = arith.cmpi eq, %arg1, %c0_i32 : i32
    %1 = arith.extui %0 : i1 to i32
    %c0_i32_0 = arith.constant 0 : i32
    %2 = arith.cmpi ne, %1, %c0_i32_0 : i32
    scf.if %2 {
      %c0_56 = arith.constant 0 : index
      %c0_57 = arith.constant 0 : index
      %c0_58 = arith.constant 0 : index
      %97 = vector.load %arg2[%c0_56, %c0_57, %c0_58] : memref<1x8x32xf32, #tpu.memory_space<vmem>>, vector<1x8x32xf32>
      %98 = vector.shape_cast %97 : vector<1x8x32xf32> to vector<8x32xf32>
      %c0_59 = arith.constant 0 : index
      %c0_60 = arith.constant 0 : index
      %99 = vector.load %arg4[%c0_59, %c0_60] : memref<32x64xf32, #tpu.memory_space<vmem>>, vector<32x64xf32>
      %cst_61 = arith.constant dense<0.000000e+00> : vector<8x64xf32>
      %100 = tpu.matmul %98, %99, %cst_61 {dimension_numbers = #tpu.dot_dimension_numbers<[1], [0], [0], [1], [0, 0, 1, 1], [], []>} : vector<8x32xf32>, vector<32x64xf32>, vector<8x64xf32> -> vector<8x64xf32>
      %101 = vector.extract_strided_slice %100 {offsets = [0, 0], sizes = [8, 32], strides = [1, 1]} : vector<8x64xf32> to vector<8x32xf32>
      %102 = tpu.transpose %101, [1, 0] : vector<8x32xf32> -> vector<32x8xf32>
      %c0_62 = arith.constant 0 : index
      %c0_63 = arith.constant 0 : index
      %103 = vector.load %arg8[%c0_62, %c0_63] : memref<32x8xf32, #tpu.memory_space<vmem>>, vector<32x8xf32>
      tpu.vector_store %arg8[%c0_62, %c0_63], %102 {strides = array<i32>} : memref<32x8xf32, #tpu.memory_space<vmem>>, vector<32x8xf32>,
      %104 = vector.extract_strided_slice %100 {offsets = [0, 32], sizes = [8, 32], strides = [1, 1]} : vector<8x64xf32> to vector<8x32xf32>
      %c0_64 = arith.constant 0 : index
      %c0_65 = arith.constant 0 : index
      %105 = vector.load %arg9[%c0_64, %c0_65] : memref<8x32xf32, #tpu.memory_space<vmem>>, vector<8x32xf32>
      tpu.vector_store %arg9[%c0_64, %c0_65], %104 {strides = array<i32>} : memref<8x32xf32, #tpu.memory_space<vmem>>, vector<8x32xf32>,
    } else {
    }
    %c8_i32 = arith.constant 8 : i32
    %3 = arith.muli %arg1, %c8_i32 : i32
    %4 = tpu.assume_multiple %3, 8 : i32
    %c0 = arith.constant 0 : index
    %5 = arith.index_cast %4 : i32 to index
    %c0_1 = arith.constant 0 : index
    %6 = vector.load %arg2[%c0, %5, %c0_1] : memref<1x8x32xf32, #tpu.memory_space<vmem>>, vector<1x8x32xf32>
    %7 = vector.shape_cast %6 : vector<1x8x32xf32> to vector<8x32xf32>
    %c0_2 = arith.constant 0 : index
    %c0_3 = arith.constant 0 : index
    %8 = vector.load %arg3[%c0_2, %c0_3] : memref<32x32xf32, #tpu.memory_space<vmem>>, vector<32x32xf32>
    %cst = arith.constant dense<0.000000e+00> : vector<8x32xf32>
    %9 = tpu.matmul %7, %8, %cst {dimension_numbers = #tpu.dot_dimension_numbers<[1], [0], [0], [1], [0, 0, 1, 1], [], []>} : vector<8x32xf32>, vector<32x32xf32>, vector<8x32xf32> -> vector<8x32xf32>
    %10 = tpu.iota {dimensions = array<i32: 0>} : vector<8x8xi32>
    %c8_i32_4 = arith.constant 8 : i32
    %11 = arith.muli %arg1, %c8_i32_4 : i32
    %12 = vector.broadcast %11 : i32 to vector<8x8xi32>
    %13 = arith.addi %10, %12 : vector<8x8xi32>
    %14 = tpu.iota {dimensions = array<i32: 1>} : vector<8x8xi32>
    %15 = arith.cmpi sle, %14, %13 : vector<8x8xi32>
    %16 = vector.extract_strided_slice %9 {offsets = [0, 0], sizes = [8, 8], strides = [1, 1]} : vector<8x32xf32> to vector<8x8xf32>
    %c0_5 = arith.constant 0 : index
    %c0_6 = arith.constant 0 : index
    %17 = vector.load %arg8[%c0_5, %c0_6] : memref<32x8xf32, #tpu.memory_space<vmem>>, vector<8x8xf32>
    %cst_7 = arith.constant dense<0.000000e+00> : vector<8x8xf32>
    %18 = tpu.matmul %16, %17, %cst_7 {dimension_numbers = #tpu.dot_dimension_numbers<[1], [0], [0], [1], [0, 0, 1, 1], [], []>} : vector<8x8xf32>, vector<8x8xf32>, vector<8x8xf32> -> vector<8x8xf32>
    %cst_8 = arith.constant -1.000000e+30 : f32
    %19 = vector.broadcast %cst_8 : f32 to vector<8x8xf32>
    %20 = arith.select %15, %18, %19 : vector<8x8xi1>, vector<8x8xf32>
    %cst_9 = arith.constant dense<0xFF800000> : vector<8xf32>
    %21 = vector.multi_reduction <maximumf>, %20, %cst_9 [1] : vector<8x8xf32> to vector<8xf32>
    %22 = vector.shape_cast %21 : vector<8xf32> to vector<8x1xf32>
    %23 = vector.broadcast %22 : vector<8x1xf32> to vector<8x8xf32>
    %24 = arith.subf %20, %23 : vector<8x8xf32>
    %25 = math.exp %24 : vector<8x8xf32>
    %cst_10 = arith.constant dense<0.000000e+00> : vector<8xf32>
    %26 = vector.multi_reduction <add>, %25, %cst_10 [1] : vector<8x8xf32> to vector<8xf32>
    %27 = vector.shape_cast %26 : vector<8xf32> to vector<8x1xf32>
    %28 = tpu.reciprocal %27 {approx = true} : vector<8x1xf32> -> vector<8x1xf32>
    %29 = vector.broadcast %28 : vector<8x1xf32> to vector<8x8xf32>
    %30 = arith.mulf %25, %29 : vector<8x8xf32>
    %c0_11 = arith.constant 0 : index
    %c0_12 = arith.constant 0 : index
    %31 = vector.load %arg9[%c0_11, %c0_12] : memref<8x32xf32, #tpu.memory_space<vmem>>, vector<8x8xf32>
    %cst_13 = arith.constant dense<0.000000e+00> : vector<8x8xf32>
    %32 = tpu.matmul %30, %31, %cst_13 {dimension_numbers = #tpu.dot_dimension_numbers<[1], [0], [0], [1], [0, 0, 1, 1], [], []>} : vector<8x8xf32>, vector<8x8xf32>, vector<8x8xf32> -> vector<8x8xf32>
    %c0_14 = arith.constant 0 : index
    %c0_15 = arith.constant 0 : index
    %33 = vector.load %arg10[%c0_14, %c0_15] : memref<8x32xf32, #tpu.memory_space<vmem>>, vector<8x8xf32>
    tpu.vector_store %arg10[%c0_14, %c0_15], %32 {strides = array<i32>} : memref<8x32xf32, #tpu.memory_space<vmem>>, vector<8x8xf32>,
    %34 = vector.extract_strided_slice %9 {offsets = [0, 8], sizes = [8, 8], strides = [1, 1]} : vector<8x32xf32> to vector<8x8xf32>
    %c8 = arith.constant 8 : index
    %c0_16 = arith.constant 0 : index
    %35 = vector.load %arg8[%c8, %c0_16] : memref<32x8xf32, #tpu.memory_space<vmem>>, vector<8x8xf32>
    %cst_17 = arith.constant dense<0.000000e+00> : vector<8x8xf32>
    %36 = tpu.matmul %34, %35, %cst_17 {dimension_numbers = #tpu.dot_dimension_numbers<[1], [0], [0], [1], [0, 0, 1, 1], [], []>} : vector<8x8xf32>, vector<8x8xf32>, vector<8x8xf32> -> vector<8x8xf32>
    %cst_18 = arith.constant -1.000000e+30 : f32
    %37 = vector.broadcast %cst_18 : f32 to vector<8x8xf32>
    %38 = arith.select %15, %36, %37 : vector<8x8xi1>, vector<8x8xf32>
    %cst_19 = arith.constant dense<0xFF800000> : vector<8xf32>
    %39 = vector.multi_reduction <maximumf>, %38, %cst_19 [1] : vector<8x8xf32> to vector<8xf32>
    %40 = vector.shape_cast %39 : vector<8xf32> to vector<8x1xf32>
    %41 = vector.broadcast %40 : vector<8x1xf32> to vector<8x8xf32>
    %42 = arith.subf %38, %41 : vector<8x8xf32>
    %43 = math.exp %42 : vector<8x8xf32>
    %cst_20 = arith.constant dense<0.000000e+00> : vector<8xf32>
    %44 = vector.multi_reduction <add>, %43, %cst_20 [1] : vector<8x8xf32> to vector<8xf32>
    %45 = vector.shape_cast %44 : vector<8xf32> to vector<8x1xf32>
    %46 = tpu.reciprocal %45 {approx = true} : vector<8x1xf32> -> vector<8x1xf32>
    %47 = vector.broadcast %46 : vector<8x1xf32> to vector<8x8xf32>
    %48 = arith.mulf %43, %47 : vector<8x8xf32>
    %c0_21 = arith.constant 0 : index
    %c8_22 = arith.constant 8 : index
    %49 = vector.load %arg9[%c0_21, %c8_22] : memref<8x32xf32, #tpu.memory_space<vmem>>, vector<8x8xf32>
    %cst_23 = arith.constant dense<0.000000e+00> : vector<8x8xf32>
    %50 = tpu.matmul %48, %49, %cst_23 {dimension_numbers = #tpu.dot_dimension_numbers<[1], [0], [0], [1], [0, 0, 1, 1], [], []>} : vector<8x8xf32>, vector<8x8xf32>, vector<8x8xf32> -> vector<8x8xf32>
    %c0_24 = arith.constant 0 : index
    %c8_25 = arith.constant 8 : index
    %51 = vector.load %arg10[%c0_24, %c8_25] : memref<8x32xf32, #tpu.memory_space<vmem>>, vector<8x8xf32>
    tpu.vector_store %arg10[%c0_24, %c8_25], %50 {strides = array<i32>} : memref<8x32xf32, #tpu.memory_space<vmem>>, vector<8x8xf32>,
    %52 = vector.extract_strided_slice %9 {offsets = [0, 16], sizes = [8, 8], strides = [1, 1]} : vector<8x32xf32> to vector<8x8xf32>
    %c16 = arith.constant 16 : index
    %c0_26 = arith.constant 0 : index
    %53 = vector.load %arg8[%c16, %c0_26] : memref<32x8xf32, #tpu.memory_space<vmem>>, vector<8x8xf32>
    %cst_27 = arith.constant dense<0.000000e+00> : vector<8x8xf32>
    %54 = tpu.matmul %52, %53, %cst_27 {dimension_numbers = #tpu.dot_dimension_numbers<[1], [0], [0], [1], [0, 0, 1, 1], [], []>} : vector<8x8xf32>, vector<8x8xf32>, vector<8x8xf32> -> vector<8x8xf32>
    %cst_28 = arith.constant -1.000000e+30 : f32
    %55 = vector.broadcast %cst_28 : f32 to vector<8x8xf32>
    %56 = arith.select %15, %54, %55 : vector<8x8xi1>, vector<8x8xf32>
    %cst_29 = arith.constant dense<0xFF800000> : vector<8xf32>
    %57 = vector.multi_reduction <maximumf>, %56, %cst_29 [1] : vector<8x8xf32> to vector<8xf32>
    %58 = vector.shape_cast %57 : vector<8xf32> to vector<8x1xf32>
    %59 = vector.broadcast %58 : vector<8x1xf32> to vector<8x8xf32>
    %60 = arith.subf %56, %59 : vector<8x8xf32>
    %61 = math.exp %60 : vector<8x8xf32>
    %cst_30 = arith.constant dense<0.000000e+00> : vector<8xf32>
    %62 = vector.multi_reduction <add>, %61, %cst_30 [1] : vector<8x8xf32> to vector<8xf32>
    %63 = vector.shape_cast %62 : vector<8xf32> to vector<8x1xf32>
    %64 = tpu.reciprocal %63 {approx = true} : vector<8x1xf32> -> vector<8x1xf32>
    %65 = vector.broadcast %64 : vector<8x1xf32> to vector<8x8xf32>
    %66 = arith.mulf %61, %65 : vector<8x8xf32>
    %c0_31 = arith.constant 0 : index
    %c16_32 = arith.constant 16 : index
    %67 = vector.load %arg9[%c0_31, %c16_32] : memref<8x32xf32, #tpu.memory_space<vmem>>, vector<8x8xf32>
    %cst_33 = arith.constant dense<0.000000e+00> : vector<8x8xf32>
    %68 = tpu.matmul %66, %67, %cst_33 {dimension_numbers = #tpu.dot_dimension_numbers<[1], [0], [0], [1], [0, 0, 1, 1], [], []>} : vector<8x8xf32>, vector<8x8xf32>, vector<8x8xf32> -> vector<8x8xf32>
    %c0_34 = arith.constant 0 : index
    %c16_35 = arith.constant 16 : index
    %69 = vector.load %arg10[%c0_34, %c16_35] : memref<8x32xf32, #tpu.memory_space<vmem>>, vector<8x8xf32>
    tpu.vector_store %arg10[%c0_34, %c16_35], %68 {strides = array<i32>} : memref<8x32xf32, #tpu.memory_space<vmem>>, vector<8x8xf32>,
    %70 = vector.extract_strided_slice %9 {offsets = [0, 24], sizes = [8, 8], strides = [1, 1]} : vector<8x32xf32> to vector<8x8xf32>
    %c24 = arith.constant 24 : index
    %c0_36 = arith.constant 0 : index
    %71 = vector.load %arg8[%c24, %c0_36] : memref<32x8xf32, #tpu.memory_space<vmem>>, vector<8x8xf32>
    %cst_37 = arith.constant dense<0.000000e+00> : vector<8x8xf32>
    %72 = tpu.matmul %70, %71, %cst_37 {dimension_numbers = #tpu.dot_dimension_numbers<[1], [0], [0], [1], [0, 0, 1, 1], [], []>} : vector<8x8xf32>, vector<8x8xf32>, vector<8x8xf32> -> vector<8x8xf32>
    %cst_38 = arith.constant -1.000000e+30 : f32
    %73 = vector.broadcast %cst_38 : f32 to vector<8x8xf32>
    %74 = arith.select %15, %72, %73 : vector<8x8xi1>, vector<8x8xf32>
    %cst_39 = arith.constant dense<0xFF800000> : vector<8xf32>
    %75 = vector.multi_reduction <maximumf>, %74, %cst_39 [1] : vector<8x8xf32> to vector<8xf32>
    %76 = vector.shape_cast %75 : vector<8xf32> to vector<8x1xf32>
    %77 = vector.broadcast %76 : vector<8x1xf32> to vector<8x8xf32>
    %78 = arith.subf %74, %77 : vector<8x8xf32>
    %79 = math.exp %78 : vector<8x8xf32>
    %cst_40 = arith.constant dense<0.000000e+00> : vector<8xf32>
    %80 = vector.multi_reduction <add>, %79, %cst_40 [1] : vector<8x8xf32> to vector<8xf32>
    %81 = vector.shape_cast %80 : vector<8xf32> to vector<8x1xf32>
    %82 = tpu.reciprocal %81 {approx = true} : vector<8x1xf32> -> vector<8x1xf32>
    %83 = vector.broadcast %82 : vector<8x1xf32> to vector<8x8xf32>
    %84 = arith.mulf %79, %83 : vector<8x8xf32>
    %c0_41 = arith.constant 0 : index
    %c24_42 = arith.constant 24 : index
    %85 = vector.load %arg9[%c0_41, %c24_42] : memref<8x32xf32, #tpu.memory_space<vmem>>, vector<8x8xf32>
    %cst_43 = arith.constant dense<0.000000e+00> : vector<8x8xf32>
    %86 = tpu.matmul %84, %85, %cst_43 {dimension_numbers = #tpu.dot_dimension_numbers<[1], [0], [0], [1], [0, 0, 1, 1], [], []>} : vector<8x8xf32>, vector<8x8xf32>, vector<8x8xf32> -> vector<8x8xf32>
    %c0_44 = arith.constant 0 : index
    %c24_45 = arith.constant 24 : index
    %87 = vector.load %arg10[%c0_44, %c24_45] : memref<8x32xf32, #tpu.memory_space<vmem>>, vector<8x8xf32>
    tpu.vector_store %arg10[%c0_44, %c24_45], %86 {strides = array<i32>} : memref<8x32xf32, #tpu.memory_space<vmem>>, vector<8x8xf32>,
    %c0_46 = arith.constant 0 : index
    %c0_47 = arith.constant 0 : index
    %88 = vector.load %arg10[%c0_46, %c0_47] : memref<8x32xf32, #tpu.memory_space<vmem>>, vector<8x32xf32>
    %c0_48 = arith.constant 0 : index
    %c0_49 = arith.constant 0 : index
    %89 = vector.load %arg5[%c0_48, %c0_49] : memref<32x32xf32, #tpu.memory_space<vmem>>, vector<32x32xf32>
    %cst_50 = arith.constant dense<0.000000e+00> : vector<8x32xf32>
    %90 = tpu.matmul %88, %89, %cst_50 {dimension_numbers = #tpu.dot_dimension_numbers<[1], [0], [0], [1], [0, 0, 1, 1], [], []>} : vector<8x32xf32>, vector<32x32xf32>, vector<8x32xf32> -> vector<8x32xf32>
    %c0_51 = arith.constant 0 : index
    %c0_52 = arith.constant 0 : index
    %91 = vector.load %arg6[%c0_51, %c0_52] : memref<1x32xf32, #tpu.memory_space<vmem>>, vector<1x32xf32>
    %92 = vector.broadcast %91 : vector<1x32xf32> to vector<8x32xf32>
    %93 = arith.addf %90, %92 : vector<8x32xf32>
    %c0_53 = arith.constant 0 : index
    %c0_54 = arith.constant 0 : index
    %c0_55 = arith.constant 0 : index
    %94 = vector.load %arg7[%c0_53, %c0_54, %c0_55] : memref<1x8x32xf32, #tpu.memory_space<vmem>>, vector<1x8x32xf32>
    %95 = vector.shape_cast %94 : vector<1x8x32xf32> to vector<8x32xf32>
    %96 = vector.shape_cast %93 : vector<8x32xf32> to vector<1x8x32xf32>
    tpu.vector_store %arg7[%c0_53, %c0_54, %c0_55], %96 {strides = array<i32>} : memref<1x8x32xf32, #tpu.memory_space<vmem>>, vector<1x8x32xf32>,
    return
  }
  func.func @transform_0(%arg0: i32, %arg1: i32) -> (i32, i32, i32) {
    %c0_i32 = arith.constant 0 : i32
    %c0_i32_0 = arith.constant 0 : i32
    %c0_i32_1 = arith.constant 0 : i32
    return %arg0, %c0_i32, %c0_i32_0 : i32, i32, i32
  }
  func.func @transform_1(%arg0: i32, %arg1: i32) -> (i32, i32) {
    %c0_i32 = arith.constant 0 : i32
    %c0_i32_0 = arith.constant 0 : i32
    %c0_i32_1 = arith.constant 0 : i32
    return %c0_i32, %c0_i32_0 : i32, i32
  }
  func.func @transform_2(%arg0: i32, %arg1: i32) -> (i32, i32) {
    %c0_i32 = arith.constant 0 : i32
    %c0_i32_0 = arith.constant 0 : i32
    %c0_i32_1 = arith.constant 0 : i32
    return %c0_i32, %c0_i32_0 : i32, i32
  }
  func.func @transform_3(%arg0: i32, %arg1: i32) -> (i32, i32) {
    %c0_i32 = arith.constant 0 : i32
    %c0_i32_0 = arith.constant 0 : i32
    %c0_i32_1 = arith.constant 0 : i32
    return %c0_i32, %c0_i32_0 : i32, i32
  }
  func.func @transform_4(%arg0: i32, %arg1: i32) -> (i32, i32) {
    %c0_i32 = arith.constant 0 : i32
    %c0_i32_0 = arith.constant 0 : i32
    %c0_i32_1 = arith.constant 0 : i32
    return %c0_i32, %c0_i32_0 : i32, i32
  }
  func.func @transform_5(%arg0: i32, %arg1: i32) -> (i32, i32, i32) {
    %c0_i32 = arith.constant 0 : i32
    %c0_i32_0 = arith.constant 0 : i32
    return %arg0, %arg1, %c0_i32 : i32, i32, i32
  }
}

</mosaic_0001>

<bundles_post_ra>
// kernel: multi_head_attention.1
= control target key start
LH: loop header
LB: loop body
LE: loop exit
PB: predicated region body
PF: predicated region fallthrough
CT: control target
= control target key end

     0   :  { %10 = vsyncpa [#allocation6], 0  ;;  %s1863_s0 = inlined_call_operand.vmem [shape: f32[2,8,32], index: 0, kind: input, shape index: {}]   ;;  %s1864_s1 = inlined_call_operand.vmem [shape: f32[32,32], index: 1, kind: input, shape index: {}]   ;;  %s1865_s2 = inlined_call_operand.vmem [shape: f32[32,64], index: 2, kind: input, shape index: {}]   ;;  %s1866_s3 = inlined_call_operand.vmem [shape: f32[32,32], index: 3, kind: input, shape index: {}]   ;;  %s1867_s4 = inlined_call_operand.vmem [shape: f32[1,32], index: 4, kind: input, shape index: {}]   ;;  %s1868_s5 = inlined_call_operand.hbm [shape: f32[2,8,32], index: 5, kind: output, shape index: {}]  }
   0x1   :  { %12 = vsyncpa [#allocation6 + $0x1], 0  ;;  %s1640_s18 = smov 0   ;;  %s1642_s19 = smov 0  }
   0x2   :  { %s1644_s20 = smov 0   ;;  %s1646_s21 = smov 0  }
   0x3   :  { %s1648_s22 = smov 0   ;;  %s1650_s23 = smov 0  }
   0x4 LB: > { %s1293_s24 = sadd.s32 4294967295, %s1597_s23   ;;  %s1294_s25 = sadd.s32 4294967294, %s1597_s23   ;;  %s1597_s23 = sphi %s1650_s23, %s18_s23   ;;  %s1593_s22 = sphi %s1648_s22, %s1875_s22   ;;  %s1589_s21 = sphi %s1646_s21, %s1874_s21   ;;  %s1585_s20 = sphi %s1644_s20, %s1873_s20   ;;  %s1581_s19 = sphi %s1642_s19, %s1872_s19   ;;  %s1577_s18 = sphi %s1640_s18, %s1871_s18  }
   0x5   : > { %s30_s26 = sadd.s32 1, %s1593_s22  ;;  %s149_s27 = sadd.s32 1, %s1585_s20 }
   0x6   : > { %p32_p0 = scmp.ge.s32.totalorder %s30_s26, 2  ;;  %p159_p1 = scmp.ne.s32.totalorder %s1585_s20, %s1581_s19 }
   0x7   : > { %p160_p2 = scmp.eq.s32.totalorder %s1293_s24, 1  ;;  %p165_p3 = scmp.ne.s32.totalorder %s1581_s19, %s1577_s18 }
   0x8   : > { %s1877_s26 = smov (%p32_p0, %s30_s26), 0  ;;  %p166_p5 = scmp.eq.s32.totalorder %s1294_s25, 1 }
   0x9   : > { %p1680_p4 = por %p160_p2, %p159_p1  ;;  %s144_s29 = ssub.s32 %s1593_s22, %s1877_s26 }
   0xa   : > { %p1297_p6 = scmp.ge.s32.totalorder %s1597_s23, 1  ;;  %p147_p7 = scmp.eq.s32.totalorder %s144_s29, 0 }
   0xb   : > { %p1687_p8 = por %p166_p5, %p165_p3  ;;  %p203_p9 = scmp.lt.s32.totalorder %s1597_s23, 3 }
   0xc   : > { %s1693_s6 = scalar_select %p147_p7, %s1585_s20, %s149_s27  }
   0xd   : > { %p204_p10 = pnand %p1297_p6, %p203_p9 }
   0xe   : > { %v362_v0 = vld [vmem:[%s1864_s1] sm:$0xff] (!%p204_p10)  ;;  %v363_v1 = vld [vmem:[%s1864_s1 + $0x8] sm:$0xff] (!%p204_p10)  ;;  %v364_v2 = vld [vmem:[%s1864_s1 + $0x10] sm:$0xff] (!%p204_p10)  ;;  %v1599_v3 = vmov (!%p204_p10), 0.0|0.0   ;;  %vm1600_vm0 = vmmov (!%p204_p10), 0   ;;  %v1601_v6 = vmov (!%p204_p10), 0.0   ;;  %v440_v30 = vlaneseq (!%p204_p10) }
   0xf   : > { %207 = sbr.rel (%p204_p10) target bundleno = 1565 (0x61d), region = 40  ;;  %1426 = vmatprep.subr.bf16.mxu1 (!%p204_p10), %v1599_v3  ;;  %v1427_v4 = vpack.c.bf16 (!%p204_p10), %v363_v1, %v362_v0  ;;  %v365_v5 = vld [vmem:[%s1864_s1 + $0x18] sm:$0xff] (!%p204_p10)  ;;  %1366 = vmatprep.mubr.msk.f32.mxu1 (!%p204_p10), %vm1600_vm0, %v1601_v6  ;;  %p230_p11 = scmp.lt.s32.totalorder (!%p204_p10), %s1589_s21, 1  ;;  %v239_v7 = vld [vmem:[%s1865_s2] sm:$0xff] (!%p204_p10)  ;;  %v240_v8 = vld [vmem:[%s1865_s2 + $0x8] sm:$0xff] (!%p204_p10)  ;;  %vm243_vm1 = vcmask (!%p204_p10), 261120  }
  0x10   : > { %1420 = vmatprep.subr.bf16.mxu0 (!%p204_p10), %v1599_v3  ;;  %v1421_v9 = vpack.c.bf16 (!%p204_p10), %v240_v8, %v239_v7  ;;  %v241_v10 = vld [vmem:[%s1865_s2 + $0x10] sm:$0xff] (!%p204_p10)  ;;  %v242_v11 = vld [vmem:[%s1865_s2 + $0x18] sm:$0xff] (!%p204_p10)  ;;  %1355 = vmatprep.mubr.msk.f32.mxu0 (!%p204_p10), %vm1600_vm0, %v1601_v6  ;;  %v1430_v12 = vpack.c.bf16 (!%p204_p10), %v365_v5, %v364_v2  ;;  %s1602_s13 = smov (!%p204_p10), 104   ;;  %s1603_s14 = smov (!%p204_p10), 120   ;;  %vm349_vm2 = vcmask (!%p204_p10), 64512   ;;  %v441_v31 = vshrl.u32 (!%p204_p10), %v440_v30, 7 }
  0x11   : > { %1428 = vmatpush3.bf16.msra.mxu1 (!%p204_p10), %v1427_v4  ;;  %v1424_v13 = vpack.c.bf16 (!%p204_p10), %v242_v11, %v241_v10  ;;  %s1604_s15 = smov (!%p204_p10), 112   ;;  %v445_v32 = vand.u32 (!%p204_p10), 127, %v440_v30  ;;  %s1605_s16 = smov (!%p204_p10), 96   ;;  %v1124_v30 = vld [vmem:[%s1866_s3 + $0x8] sm:$0xff] (!%p204_p10)  ;;  %vm778_vm4 = vcmask (!%p204_p10), 130112   ;;  %vm949_vm5 = vcmask (!%p204_p10), 195712  }
  0x12   : > { %1429 = vmatprep.subr.bf16.mxu1 (!%p204_p10), %v1599_v3  ;;  %1422 = vmatpush3.bf16.msra.mxu0 (!%p204_p10), %v1421_v9  ;;  %s1606_s17 = smov (!%p204_p10), 8   ;;  %s1607_s24 = smov (!%p204_p10), 16   ;;  %vm1120_vm6 = vcmask (!%p204_p10), 261312  }
  0x13   : > { %1423 = vmatprep.subr.bf16.mxu0 (!%p204_p10), %v1599_v3  ;;  %vm446_vm3 = vcmp.le.s32.totalorder (!%p204_p10), %v445_v32, %v441_v31  ;;  %v1125_v32 = vld [vmem:[%s1866_s3 + $0x10] sm:$0xff] (!%p204_p10) }
  0x15   : > { %1431 = vmatpush3.bf16.msra.mxu1 (!%p204_p10), %v1430_v12 }
  0x16   : > { %s231_s8 = scalar_select %p230_p11, %s1589_s21, 1  ;;  %1425 = vmatpush3.bf16.msra.mxu0 %v1424_v13  ;;  %1369 = vmatprep.subr.mxu1 %v1601_v6 }
  0x17   : > { %1379 = vmatprep.subr.mxu0 %v1601_v6 }
  0x18   : > { %s1299_s9 = sshll.u32 %s231_s8, 3 }
  0x19   : > { %s233_s12 = scalar_lea.vmem %s1863_s0, %s1299_s9 }
  0x1a   : > { %v361_v14 = vld [vmem:[%s233_s12] sm:$0xff]  ;;  %s1608_s12 = smov 24  }
  0x1b   : > { %1367 = vmatmul.mubr.msk.f32.vlgmr.msra.gmra.mrb[0].mxu1 %vm243_vm1, %v361_v14  ;;  %1356 = vmatmul.mubr.msk.f32.vlgmr.msra.gmra.mrb[0].mxu0 %vm243_vm1, %v361_v14 }
  0x1c   : > { %1371 = vmatprep.mubr.msk.f32.mxu1 %vm1600_vm0, %v1601_v6  ;;  %1381 = vmatprep.mubr.msk.f32.mxu0 %vm1600_vm0, %v1601_v6 }
  0xee   : > { %v436_v15 = vpop.f32.mrb[0].mxu1  ;;  %v313_v17 = vpop.f32.mrb[0].mxu0 }
  0xef   : > { %952 = vrot.lane.b32.xlu1 %v436_v15, %s1602_s13  ;;  %610 = vrot.lane.b32.xlu0 %v436_v15, %s1603_s14  ;;  %v1368_v16 = vpop.f32.mrb[1].mxu1  ;;  %v1357_v18 = vpop.f32.mrb[1].mxu0 }
  0xf3   : > { %781 = vrot.lane.b32.xlu0 %v436_v15, %s1604_s15 }
 0x118   : > { %317 = vxpose.xlu1.b32.start.end [1/1] (short) (narrow) %v313_v17, 32 }
 0x161   : > { %v953_v19 = vpop.permute.xlu1 %952  ;;  %v611_v24 = vpop.permute.xlu0 %610 }
 0x165   : > { %v782_v28 = vpop.permute.xlu0 %781 }
 0x198   : > { %v333_v20 = vpop.trf.xlu1 }
 0x199   : > { %350 = vst.msk [vmem:[#allocation2] sm:$0xff] %vm349_vm2, %v333_v20 }
 0x19c   : > { %v334_v21 = vpop.trf.xlu1 }
 0x19d   : > { %351 = vst.msk [vmem:[#allocation2 + $0x8] sm:$0xff] %vm349_vm2, %v334_v21 }
 0x1a0   : > { %v335_v22 = vpop.trf.xlu1  ;;  %v447_v23 = vld [vmem:[#allocation2] sm:$0xff] }
 0x1a1   : > { %352 = vst.msk [vmem:[#allocation2 + $0x10] sm:$0xff] %vm349_vm2, %v335_v22  ;;  %1370 = vmatpush3.msra.mxu1 %v447_v23 }
 0x1a2   : > { %1372 = vmatmul.mubr.msk.f32.vlgmr.msra.gmra.mrb[2].mxu1 %vm349_vm2, %v436_v15  ;;  %1374 = vmatprep.subr.mxu1 %v1601_v6 }
 0x1a3   : > { %1376 = vmatprep.mubr.msk.f32.mxu1 %vm1600_vm0, %v1601_v6 }
 0x1a4   : > { %v336_v25 = vpop.trf.xlu1  ;;  %v609_v26 = vld [vmem:[#allocation2 + $0x8] sm:$0xff] }
 0x1a5   : > { %353 = vst.msk [vmem:[#allocation2 + $0x18] sm:$0xff] %vm349_vm2, %v336_v25  ;;  %1380 = vmatpush3.msra.mxu0 %v609_v26 }
 0x1a6   : > { %1382 = vmatmul.mubr.msk.f32.vlgmr.msra.gmra.mrb[2].mxu0 %vm349_vm2, %v611_v24  ;;  %1389 = vmatprep.subr.mxu0 %v1601_v6 }
 0x1a7   : > { %1391 = vmatprep.mubr.msk.f32.mxu0 %vm1600_vm0, %v1601_v6 }
 0x1a8   : > { %v780_v27 = vld [vmem:[#allocation2 + $0x10] sm:$0xff] }
 0x1a9   : > { %1390 = vmatpush3.msra.mxu0 %v780_v27 }
 0x1aa   : > { %1392 = vmatmul.mubr.msk.f32.vlgmr.msra.gmra.mrb[4].mxu0 %vm349_vm2, %v782_v28  ;;  %1399 = vmatprep.subr.mxu0 %v1601_v6 }
 0x1ab   : > { %1401 = vmatprep.mubr.msk.f32.mxu0 %vm1600_vm0, %v1601_v6 }
 0x1ac   : > { %v951_v29 = vld [vmem:[#allocation2 + $0x18] sm:$0xff] }
 0x1ad   : > { %1400 = vmatpush3.msra.mxu0 %v951_v29  ;;  %v1123_v29 = vld [vmem:[%s1866_s3] sm:$0xff] }
 0x1ae   : > { %1402 = vmatmul.mubr.msk.f32.vlgmr.msra.gmra.mrb[6].mxu0 %vm349_vm2, %v953_v19  ;;  %1432 = vmatprep.subr.bf16.mxu0 %v1599_v3  ;;  %v1433_v31 = vpack.c.bf16 %v1124_v30, %v1123_v29 }
 0x1af   : > { %1417 = vmatprep.mubr.msk.f32.mxu0 %vm1600_vm0, %v1601_v6 }
 0x1b0   : > { %1434 = vmatpush3.bf16.msra.mxu0 %v1433_v31 }
 0x1b1   : > { %1435 = vmatprep.subr.bf16.mxu0 %v1599_v3  ;;  %v1310_v3 = vld [vmem:[%s1867_s4] ss:$0 sm:$0xff] }
 0x275   : > { %v518_v33 = vpop.f32.mrb[2].mxu1 }
 0x276   : > { %v522_v34 = vsel %vm446_vm3, %v518_v33, -1e+30  ;;  %v1373_v35 = vpop.f32.mrb[3].mxu1  ;;  %v1126_v33 = vld [vmem:[%s1866_s3 + $0x18] sm:$0xff] }
 0x277   : > { %v523_v36 = vsel %vm349_vm2, %v522_v34, -inf }
 0x278   : > { %524 = vmax.xlane.f32.xlu0 %v523_v36 }
 0x279   : > { %v680_v37 = vpop.f32.mrb[2].mxu0 }
 0x27a   : > { %v684_v38 = vsel %vm446_vm3, %v680_v37, -1e+30  ;;  %v1383_v39 = vpop.f32.mrb[3].mxu0 }
 0x27b   : > { %v685_v40 = vsel %vm349_vm2, %v684_v38, -inf }
 0x27c   : > { %686 = vmax.xlane.f32.xlu0 %v685_v40 }
 0x27d   : > { %v851_v41 = vpop.f32.mrb[4].mxu0 }
 0x27e   : > { %v855_v42 = vsel %vm446_vm3, %v851_v41, -1e+30  ;;  %v1393_v43 = vpop.f32.mrb[5].mxu0 }
 0x27f   : > { %v856_v44 = vsel %vm349_vm2, %v855_v42, -inf }
 0x280   : > { %857 = vmax.xlane.f32.xlu0 %v856_v44 }
 0x281   : > { %v1022_v45 = vpop.f32.mrb[6].mxu0 }
 0x282   : > { %v1026_v46 = vsel %vm446_vm3, %v1022_v45, -1e+30  ;;  %v1403_v47 = vpop.f32.mrb[7].mxu0 }
 0x283   : > { %v1027_v48 = vsel %vm349_vm2, %v1026_v46, -inf }
 0x284   : > { %1028 = vmax.xlane.f32.xlu1 %v1027_v48 }
 0x296   : > { %355 = vrot.lane.b32.xlu0 %v313_v17, %s1605_s16 }
 0x305   : > { %v525_v49 = vpop.xlane.xlu0 %524 }
 0x306   : > { %v526_v50 = vsub.f32 %v522_v34, %v525_v49  ;;  %v1436_v34 = vpack.c.bf16 %v1126_v33, %v1125_v32 }
 0x308   : > { %v527_v51 = vmul.f32 1.442695, %v526_v50  ;;  %1437 = vmatpush3.bf16.msra.mxu0 %v1436_v34 }
 0x309   : > { %v687_v52 = vpop.xlane.xlu0 %686 }
 0x30a   : > { %1503 = vpow2.f32 %v527_v51  ;;  %v688_v53 = vsub.f32 %v684_v38, %v687_v52 }
 0x30c   : > { %v689_v54 = vmul.f32 1.442695, %v688_v53 }
 0x30d   : > { %v858_v55 = vpop.xlane.xlu0 %857 }
 0x30e   : > { %1505 = vpow2.f32 %v689_v54  ;;  %v859_v56 = vsub.f32 %v855_v42, %v858_v55 }
 0x310   : > { %v860_v57 = vmul.f32 1.442695, %v859_v56 }
 0x311   : > { %v356_v58 = vpop.permute.xlu0 %355  ;;  %v1029_v2 = vpop.xlane.xlu1 %1028 }
 0x312   : > { %1507 = vpow2.f32 %v860_v57  ;;  %358 = vst.msk [vmem:[#allocation3] sm:$0xff] %vm243_vm1, %v356_v58  ;;  %v1030_v4 = vsub.f32 %v1026_v46, %v1029_v2 }
 0x314   : > { %v1504_v59 = vpop.eup %1503  ;;  %v1031_v5 = vmul.f32 1.442695, %v1030_v4 }
 0x315   : > { %v529_v60 = vsel %vm349_vm2, %v1504_v59, 0.0 }
 0x316   : > { %530 = vadd.xlane.f32.xlu0 %v529_v60  ;;  %1509 = vpow2.f32 %v1031_v5 }
 0x318   : > { %v1506_v61 = vpop.eup %1505 }
 0x319   : > { %v534_v62 = vld [vmem:[#allocation3] sm:$0xff]  ;;  %v691_v63 = vsel %vm349_vm2, %v1506_v61, 0.0 }
 0x31a   : > { %1375 = vmatpush3.msra.mxu1 %v534_v62  ;;  %692 = vadd.xlane.f32.xlu1 %v691_v63 }
 0x31b   : > { %1384 = vmatprep.subr.mxu1 %v1601_v6 }
 0x31c   : > { %v1508_v0 = vpop.eup %1507 }
 0x31d   : > { %v862_v1 = vsel %vm349_vm2, %v1508_v0, 0.0 }
 0x31e   : > { %863 = vadd.xlane.f32.xlu0 %v862_v1 }
 0x320   : > { %v1510_v7 = vpop.eup %1509 }
 0x321   : > { %v1033_v8 = vsel %vm349_vm2, %v1510_v7, 0.0 }
 0x32b   : > { %869 = vrot.lane.b32.xlu1 %v534_v62, %s1604_s15 }
 0x334   : > { %698 = vrot.lane.b32.xlu0 %v534_v62, %s1603_s14 }
 0x34f   : > { %1034 = vadd.xlane.f32.xlu1 %v1033_v8 }
 0x360   : > { %1040 = vrot.lane.b32.xlu1 %v534_v62, %s1602_s13  ;;  %s227_s13 = sand.u32 1, %s1581_s19  }
 0x361   : > { %s1298_s14 = sshll.u32 %s227_s13, 3  ;;  %s1209_s8 = scalar_lea.sflag [#allocation6], %s227_s13 }
 0x3a3   : > { %v531_v9 = vpop.xlane.xlu0 %530 }
 0x3a4   : > { %1511 = vrcp.f32 %v531_v9 }
 0x3a7   : > { %v693_v10 = vpop.xlane.xlu1 %692 }
 0x3a8   : > { %1513 = vrcp.f32 %v693_v10 }
 0x3ab   : > { %v864_v11 = vpop.xlane.xlu0 %863  ;;  %v870_v17 = vpop.permute.xlu1 %869 }
 0x3ac   : > { %1515 = vrcp.f32 %v864_v11 }
 0x3ae   : > { %v1512_v12 = vpop.eup %1511 }
 0x3af   : > { %v533_v13 = vmul.f32 %v1512_v12, %v1504_v59  ;;  %v699_v14 = vpop.permute.xlu0 %698 }
 0x3b1   : > { %1377 = vmatmul.mubr.msk.f32.vlgmr.msra.gmra.mrb[4].mxu1 %vm349_vm2, %v533_v13 }
 0x3b2   : > { %v1514_v15 = vpop.eup %1513  ;;  %1385 = vmatpush3.msra.mxu1 %v699_v14  ;;  %1386 = vmatprep.mubr.msk.f32.mxu1 %vm1600_vm0, %v1601_v6 }
 0x3b3   : > { %v695_v16 = vmul.f32 %v1514_v15, %v1506_v61  ;;  %1394 = vmatprep.subr.mxu1 %v1601_v6 }
 0x3b5   : > { %1387 = vmatmul.mubr.msk.f32.vlgmr.msra.gmra.mrb[6].mxu1 %vm349_vm2, %v695_v16 }
 0x3b6   : > { %v1516_v18 = vpop.eup %1515  ;;  %1395 = vmatpush3.msra.mxu1 %v870_v17  ;;  %1396 = vmatprep.mubr.msk.f32.mxu1 %vm1600_vm0, %v1601_v6 }
 0x3b7   : > { %v866_v19 = vmul.f32 %v1516_v18, %v1508_v0  ;;  %1404 = vmatprep.subr.mxu1 %v1601_v6 }
 0x3b9   : > { %1397 = vmatmul.mubr.msk.f32.vlgmr.msra.gmra.mrb[8].mxu1 %vm349_vm2, %v866_v19 }
 0x3ba   : > { %1406 = vmatprep.mubr.msk.f32.mxu1 %vm1600_vm0, %v1601_v6 }
 0x3dc   : > { %v1035_v20 = vpop.xlane.xlu1 %1034 }
 0x3dd   : > { %1517 = vrcp.f32 %v1035_v20 }
 0x3e0   : > { %v1041_v21 = vpop.permute.xlu1 %1040 }
 0x3e1   : > { %1405 = vmatpush3.msra.mxu1 %v1041_v21 }
 0x3e7   : > { %v1518_v22 = vpop.eup %1517 }
 0x3e8   : > { %v1037_v23 = vmul.f32 %v1518_v22, %v1510_v7 }
 0x3ea   : > { %1407 = vmatmul.mubr.msk.f32.vlgmr.msra.gmra.mrb[10].mxu1 %vm349_vm2, %v1037_v23 }
 0x484   : > { %v604_v24 = vpop.f32.mrb[4].mxu1 }
 0x485   : > { %608 = vst.msk [vmem:[#allocation4] sm:$0xff] %vm349_vm2, %v604_v24  ;;  %v1378_v25 = vpop.f32.mrb[5].mxu1 }
 0x488   : > { %v770_v26 = vpop.f32.mrb[6].mxu1 }
 0x489   : > { %775 = vrot.lane.b32.xlu1 %v770_v26, %s1606_s17  ;;  %v1388_v27 = vpop.f32.mrb[7].mxu1  ;;  %s1313_s17 = sshll.u32 %s1589_s21, 7  ;;  %s1609_s21 = smov [#allocation5]  }
 0x48a   : > { %s1815_s7 = scalar_lea.hbm %s1868_s5, %s1313_s17  ;;  %s1523_s10 = sshll.u32 %s1609_s21, 4  ;;  %s1524_s10 = int_to_ptr.vmem [resolvable:$false] %s1523_s10 }
 0x48b   : > { %s1525_s11 = scalar_lea.vmem %s1524_s10, 256 }
 0x48c   : > { %v941_v28 = vpop.f32.mrb[8].mxu1 }
 0x48d   : > { %946 = vrot.lane.b32.xlu0 %v941_v28, %s1607_s24  ;;  %v1398_v6 = vpop.f32.mrb[9].mxu1  ;;  %s229_s24 = scalar_lea.vmem [#allocation5], %s1298_s14 }
 0x48e   : > { %s1223_s25 = sshll.u32 %s229_s24, 4  ;;  %s1817_s25 = int_to_ptr.vmem [resolvable:$true] %s1223_s25 }
 0x48f   : > { %s1519_s9 = scalar_lea.vmem %s1817_s25, 128  ;;  %p1526_p1 = scmp.lt.s32.totalorder %s1817_s25, %s1524_s10 }
 0x490   : > { %p1520_p12 = scmp.ne.s32.totalorder %s1817_s25, %s1519_s9  ;;  %p1527_p2 = scmp.lt.s32.totalorder %s1525_s11, %s1519_s9 }
 0x492   : > { %p1521_p13 = pnand %p1520_p12, %p1680_p4  ;;  %p1528_p3 = por %p1527_p2, %p1526_p1 }
 0x494   : > { %p1522_p0 = pneg %p1521_p13 }
 0x496   : > { %p1529_p5 = pnand %p1528_p3, %p1522_p0 }
 0x4bd   : > { %v1112_v35 = vpop.f32.mrb[10].mxu1 }
 0x4be   : > { %1117 = vrot.lane.b32.xlu1 %v1112_v35, %s1608_s12  ;;  %v1408_v36 = vpop.f32.mrb[11].mxu1 }
 0x4fb   : > { %v776_v37 = vpop.permute.xlu1 %775 }
 0x4fc   : > { %779 = vst.msk [vmem:[#allocation4] sm:$0xff] %vm778_vm4, %v776_v37 }
 0x4ff   : > { %v947_v38 = vpop.permute.xlu0 %946 }
 0x500   : > { %950 = vst.msk [vmem:[#allocation4] sm:$0xff] %vm949_vm5, %v947_v38 }
 0x530   : > { %v1118_v39 = vpop.permute.xlu1 %1117 }
 0x531   : > { %1121 = vst.msk [vmem:[#allocation4] sm:$0xff] %vm1120_vm6, %v1118_v39 }
 0x538   : > { %v1122_v40 = vld [vmem:[#allocation4] sm:$0xff] }
 0x539   : > { %1418 = vmatmul.mubr.msk.f32.vlgmr.msra.gmra.mrb[8].mxu0 %vm243_vm1, %v1122_v40 }
 0x60c   : > { %v1203_v41 = vpop.f32.mrb[8].mxu0 }
 0x60d   : > { %v1204_v42 = vadd.f32 %v1310_v3, %v1203_v41  ;;  %v1419_v43 = vpop.f32.mrb[9].mxu0 }
 0x60f   : > { %1207 = vst.msk [vmem:[%s229_s24] sm:$0xff] %vm243_vm1, %v1204_v42 }
 0x610   : > { %1532 = shalt.err (!%p1529_p5)
}
 0x611   : > { %s1533_s12 = scalar_lea.hbm %s1815_s7, 128  ;;  %s1537_s15 = scalar_lea.hbm %s1868_s5, 256 }
 0x612   : > { %p1534_p6 = scmp.ne.s32.totalorder %s1815_s7, %s1533_s12  ;;  %p1538_p10 = scmp.lt.u32.totalorder %s1815_s7, %s1868_s5 }
 0x613   : > { %p1539_p11 = scmp.lt.u32.totalorder %s1537_s15, %s1533_s12  ;;  %p1541_p13 = scmp.lt.u32.totalorder %s1533_s12, %s1815_s7 }
 0x614   : > { %p1535_p7 = pnand %p1534_p6, %p1680_p4 }
 0x615   : > { %p1540_p12 = por %p1539_p11, %p1538_p10 }
 0x616   : > { %p1536_p9 = pneg %p1535_p7 }
 0x617   : > { %p1542_p0 = por %p1541_p13, %p1540_p12 }
 0x619   : > { %p1543_p1 = pnand %p1542_p0, %p1536_p9 }
 0x61b   : > { %1546 = shalt.err (!%p1543_p1)
}
 0x61c   : > { %1438 = dma.vmem_to_hbm [thread:$0]  (%p1680_p4), %s1817_s25, 128, %s1815_s7, %s1209_s8  }
 0x61d PF: > { %p1444_p2 = scmp.ge.s32.totalorder %s1597_s23, 2  ;;  %s1235_s24 = sand.u32 1, %s1577_s18  }
 0x61e   : > { %s1236_s27 = scalar_lea.sflag [#allocation6], %s1235_s24 }
 0x61f   : > { %p1441_p3 = pnand %p1444_p2, %p1687_p8 }
 0x621   : > { %1572 = dma.done.wait (!%p1441_p3), %s1236_s27, 128  }
 0x622   : > { %1574 = vsyncadd (!%p1441_p3), %s1236_s27, 4294967168  ;;  %s18_s23 = sadd.s32 1, %s1597_s23   ;;  %s1871_s18 = smov %s1581_s19 }
 0x623   : > { %p15_p5 = scmp.ge.s32.totalorder %s18_s23, 4   ;;  %s1872_s19 = smov %s1585_s20 }
 0x624   : > { %s1873_s20 = smov %s1693_s6  ;;  %s1874_s21 = smov %s1593_s22 }
 0x625   : > { %s1875_s22 = smov %s1877_s26  ;;  %17 = sbr.rel (!%p15_p5) target bundleno = 4 (0x4), region = 80 }
 0x62c   :  { %1241 = vsyncpa [#allocation6], 1 }
 0x62d   :  { %1243 = vsyncpa [#allocation6 + $0x1], 1 }

</bundles_post_ra>
